<compile_context>
chip_gen: v7x
topology: tpu7x:2x2x1
jax: 0.10.0
libtpu: 0.0.40
codegen_flags: <defaults>
</compile_context>

<pallas_src>
import functools
import math

import jax
import jax.numpy as jnp
from jax import lax
from jax.experimental import pallas as pl
from jax.experimental.pallas import tpu as pltpu


def _self_attention_kernel(xq_ref, xk_ref, wq_ref, bq_ref, wk_ref, bk_ref,
                           o_ref, q_scr, *, scale, compute_dtype):
    ki = pl.program_id(2)

    # Q projection for this (batch, q-tile) is invariant along the k-tile axis:
    # compute once (ki == 0) into VMEM scratch, reuse for all k tiles.
    @pl.when(ki == 0)
    def _():
        q = jnp.dot(xq_ref[0], wq_ref[...], preferred_element_type=jnp.float32)
        # Fold bias + 1/sqrt(D) scaling into q (T*dq work, not T*T).
        q_scr[...] = (q + bq_ref[...]) * scale

    k = jnp.dot(xk_ref[0], wk_ref[...], preferred_element_type=jnp.float32)
    k = k + bk_ref[...]

    # Contract over the last dim of both operands -> no k.T relayout.
    dot = lax.dot_general(
        q_scr[...].astype(compute_dtype),
        k.astype(compute_dtype),
        dimension_numbers=(((1,), (1,)), ((), ())),
        preferred_element_type=jnp.float32,
    )
    o_ref[0] = dot.astype(o_ref.dtype)


def _round_up(n, m):
    return ((n + m - 1) // m) * m


def _pad_last(a, target):
    pad = target - a.shape[-1]
    if pad == 0:
        return a
    widths = [(0, 0)] * (a.ndim - 1) + [(0, pad)]
    return jnp.pad(a, widths)


def self_attention(x, wq, bq, wk, bk, *, tile=512, compute_dtype=jnp.float32):
    """x: (B, T, D); wq/wk: (D, dq); bq/bk: (1, dq).  Returns (B, T, T) f32."""
    B, T, D = x.shape
    dq = wq.shape[1]
    scale = 1.0 / math.sqrt(D)  # spec divides by sqrt(data_dim)

    # Lane-dense projections: zero-pad dq up to a multiple of 128.  Padded
    # q/k columns are exactly zero, so QK^T is unchanged.
    dqp = _round_up(dq, 128)
    wq_p = _pad_last(wq, dqp).astype(compute_dtype)
    wk_p = _pad_last(wk, dqp).astype(compute_dtype)
    bq_p = _pad_last(bq, dqp).astype(jnp.float32)
    bk_p = _pad_last(bk, dqp).astype(jnp.float32)

    # Only MXU operands go to compute_dtype; bias add / scale stay f32.
    x_c = x.astype(compute_dtype)

    # Tile the (T, T) logits so VMEM usage is flat in T.
    if T <= tile:
        tq = tk = T
        Tp = T
    else:
        tq = tk = tile  # multiple of 128 -> unmasked lane-dense stores
        Tp = _round_up(T, tile)
        if Tp != T:
            x_c = jnp.pad(x_c, ((0, 0), (0, Tp - T), (0, 0)))

    grid = (B, Tp // tq, Tp // tk)

    kernel = functools.partial(_self_attention_kernel,
                               scale=scale, compute_dtype=compute_dtype)

    out = pl.pallas_call(
        kernel,
        out_shape=jax.ShapeDtypeStruct((B, Tp, Tp), jnp.float32),
        grid_spec=pltpu.PrefetchScalarGridSpec(
            num_scalar_prefetch=0,
            grid=grid,
            in_specs=[
                pl.BlockSpec((1, tq, D), lambda b, qi, ki: (b, qi, 0)),  # x (Q side)
                pl.BlockSpec((1, tk, D), lambda b, qi, ki: (b, ki, 0)),  # x (K side)
                pl.BlockSpec((D, dqp), lambda b, qi, ki: (0, 0)),        # Wq
                pl.BlockSpec((1, dqp), lambda b, qi, ki: (0, 0)),        # bq
                pl.BlockSpec((D, dqp), lambda b, qi, ki: (0, 0)),        # Wk
                pl.BlockSpec((1, dqp), lambda b, qi, ki: (0, 0)),        # bk
            ],
            out_specs=pl.BlockSpec((1, tq, tk), lambda b, qi, ki: (b, qi, ki)),
            scratch_shapes=[pltpu.VMEM((tq, dqp), jnp.float32)],
        ),
        compiler_params=pltpu.CompilerParams(
            dimension_semantics=("parallel", "parallel", "arbitrary"),
        ),
    )(x_c, x_c, wq_p, bq_p, wk_p, bk_p)

    if Tp != T:
        out = out[:, :T, :T]
    return out


def self_attention_ref(x, wq, bq, wk, bk):
    q = jnp.einsum("btd,dq->btq", x, wq) + bq[0]
    k = jnp.einsum("btd,dq->btq", x, wk) + bk[0]
    dot = jnp.einsum("btq,bsq->bts", q, k)
    return dot / jnp.sqrt(jnp.float32(x.shape[-1]))


if __name__ == "__main__":
    B, T, data_dim, dim_q = 2, 8, 32, 16

    key = jax.random.PRNGKey(0)
    kx, kwq, kbq, kwk, kbk = jax.random.split(key, 5)

    x = jax.random.normal(kx, (B, T, data_dim), dtype=jnp.float32)

    # nn.Linear-style deterministic init: U(-1/sqrt(fan_in), 1/sqrt(fan_in))
    bound = 1.0 / (data_dim ** 0.5)
    wq = jax.random.uniform(kwq, (data_dim, dim_q), jnp.float32, -bound, bound)
    bq = jax.random.uniform(kbq, (1, dim_q), jnp.float32, -bound, bound)
    wk = jax.random.uniform(kwk, (data_dim, dim_q), jnp.float32, -bound, bound)
    bk = jax.random.uniform(kbk, (1, dim_q), jnp.float32, -bound, bound)

    ref = self_attention_ref(x, wq, bq, wk, bk)

    # f32 path (matches the PyTorch module's f32 semantics).
    out = jax.block_until_ready(self_attention(x, wq, bq, wk, bk))
    assert out.shape == (B, T, T)
    assert jnp.allclose(out, ref, atol=1e-4, rtol=1e-4)

    # bf16 MXU operands, f32 accumulation (fast path on v6e / v7x).
    out_bf16 = jax.block_until_ready(
        self_attention(x, wq, bq, wk, bk, compute_dtype=jnp.bfloat16))
    assert jnp.allclose(out_bf16, ref, atol=5e-2, rtol=5e-2)

    # Exercise the tiled / padded path (T not a multiple of the tile size).
    T2 = 160
    x2 = jax.random.normal(jax.random.PRNGKey(1), (B, T2, data_dim), jnp.float32)
    out2 = jax.block_until_ready(self_attention(x2, wq, bq, wk, bk, tile=128))
    ref2 = self_attention_ref(x2, wq, bq, wk, bk)
    assert out2.shape == (B, T2, T2)
    assert jnp.allclose(out2, ref2, atol=1e-3, rtol=1e-3)

    print("KERNEL_OK")
</pallas_src>

<mosaic_0001>
module attributes {stable_mosaic.version = 11 : i64} {
  func.func @_self_attention_kernel(%arg0: i32, %arg1: i32, %arg2: i32, %arg3: memref<1x8x32xf32, #tpu.memory_space<vmem>>, %arg4: memref<1x8x32xf32, #tpu.memory_space<vmem>>, %arg5: memref<32x128xf32, #tpu.memory_space<vmem>>, %arg6: memref<1x128xf32, #tpu.memory_space<vmem>>, %arg7: memref<32x128xf32, #tpu.memory_space<vmem>>, %arg8: memref<1x128xf32, #tpu.memory_space<vmem>>, %arg9: memref<1x8x8xf32, #tpu.memory_space<vmem>>, %arg10: memref<8x128xf32, #tpu.memory_space<vmem>>) attributes {dimension_semantics = [#tpu.dimension_semantics<parallel>, #tpu.dimension_semantics<parallel>, #tpu.dimension_semantics<arbitrary>], iteration_bounds = array<i64: 2, 1, 1>, scalar_prefetch = 0 : i64, scratch_operands = 1 : i64, tpu.core_type = #tpu.core_type<tc>, window_params = [{transform_indices = @transform_0, window_bounds = array<i64: 1, 8, 32>}, {transform_indices = @transform_1, window_bounds = array<i64: 1, 8, 32>}, {pipeline_mode = #tpu.pipeline_mode<synchronous>, transform_indices = @transform_2, window_bounds = array<i64: 32, 128>}, {pipeline_mode = #tpu.pipeline_mode<synchronous>, transform_indices = @transform_3, window_bounds = array<i64: 1, 128>}, {pipeline_mode = #tpu.pipeline_mode<synchronous>, transform_indices = @transform_4, window_bounds = array<i64: 32, 128>}, {pipeline_mode = #tpu.pipeline_mode<synchronous>, transform_indices = @transform_5, window_bounds = array<i64: 1, 128>}, {transform_indices = @transform_6, window_bounds = array<i64: 1, 8, 8>}]} {
    %c0_i32 = arith.constant 0 : i32
    %0 = arith.cmpi eq, %arg2, %c0_i32 : i32
    %1 = arith.extui %0 : i1 to i32
    %c0_i32_0 = arith.constant 0 : i32
    %2 = arith.cmpi ne, %1, %c0_i32_0 : i32
    scf.if %2 {
      %c0_13 = arith.constant 0 : index
      %c0_14 = arith.constant 0 : index
      %c0_15 = arith.constant 0 : index
      %15 = vector.load %arg3[%c0_13, %c0_14, %c0_15] : memref<1x8x32xf32, #tpu.memory_space<vmem>>, vector<1x8x32xf32>
      %16 = vector.shape_cast %15 : vector<1x8x32xf32> to vector<8x32xf32>
      %c0_16 = arith.constant 0 : index
      %c0_17 = arith.constant 0 : index
      %17 = vector.load %arg5[%c0_16, %c0_17] : memref<32x128xf32, #tpu.memory_space<vmem>>, vector<32x128xf32>
      %cst_18 = arith.constant dense<0.000000e+00> : vector<8x128xf32>
      %18 = tpu.matmul %16, %17, %cst_18 {dimension_numbers = #tpu.dot_dimension_numbers<[1], [0], [0], [1], [0, 0, 1, 1], [], []>} : vector<8x32xf32>, vector<32x128xf32>, vector<8x128xf32> -> vector<8x128xf32>
      %c0_19 = arith.constant 0 : index
      %c0_20 = arith.constant 0 : index
      %19 = vector.load %arg6[%c0_19, %c0_20] : memref<1x128xf32, #tpu.memory_space<vmem>>, vector<1x128xf32>
      %20 = vector.broadcast %19 : vector<1x128xf32> to vector<8x128xf32>
      %21 = arith.addf %18, %20 : vector<8x128xf32>
      %cst_21 = arith.constant 0.176776692 : f32
      %22 = vector.broadcast %cst_21 : f32 to vector<8x128xf32>
      %23 = arith.mulf %21, %22 : vector<8x128xf32>
      %c0_22 = arith.constant 0 : index
      %c0_23 = arith.constant 0 : index
      %24 = vector.load %arg10[%c0_22, %c0_23] : memref<8x128xf32, #tpu.memory_space<vmem>>, vector<8x128xf32>
      tpu.vector_store %arg10[%c0_22, %c0_23], %23 {strides = array<i32>} : memref<8x128xf32, #tpu.memory_space<vmem>>, vector<8x128xf32>,
    } else {
    }
    %c0 = arith.constant 0 : index
    %c0_1 = arith.constant 0 : index
    %c0_2 = arith.constant 0 : index
    %3 = vector.load %arg4[%c0, %c0_1, %c0_2] : memref<1x8x32xf32, #tpu.memory_space<vmem>>, vector<1x8x32xf32>
    %4 = vector.shape_cast %3 : vector<1x8x32xf32> to vector<8x32xf32>
    %c0_3 = arith.constant 0 : index
    %c0_4 = arith.constant 0 : index
    %5 = vector.load %arg7[%c0_3, %c0_4] : memref<32x128xf32, #tpu.memory_space<vmem>>, vector<32x128xf32>
    %cst = arith.constant dense<0.000000e+00> : vector<8x128xf32>
    %6 = tpu.matmul %4, %5, %cst {dimension_numbers = #tpu.dot_dimension_numbers<[1], [0], [0], [1], [0, 0, 1, 1], [], []>} : vector<8x32xf32>, vector<32x128xf32>, vector<8x128xf32> -> vector<8x128xf32>
    %c0_5 = arith.constant 0 : index
    %c0_6 = arith.constant 0 : index
    %7 = vector.load %arg8[%c0_5, %c0_6] : memref<1x128xf32, #tpu.memory_space<vmem>>, vector<1x128xf32>
    %8 = vector.broadcast %7 : vector<1x128xf32> to vector<8x128xf32>
    %9 = arith.addf %6, %8 : vector<8x128xf32>
    %c0_7 = arith.constant 0 : index
    %c0_8 = arith.constant 0 : index
    %10 = vector.load %arg10[%c0_7, %c0_8] : memref<8x128xf32, #tpu.memory_space<vmem>>, vector<8x128xf32>
    %cst_9 = arith.constant dense<0.000000e+00> : vector<8x8xf32>
    %11 = tpu.matmul %10, %9, %cst_9 {dimension_numbers = #tpu.dot_dimension_numbers<[1], [1], [0], [0], [0, 0, 1, 0], [], []>} : vector<8x128xf32>, vector<8x128xf32>, vector<8x8xf32> -> vector<8x8xf32>
    %c0_10 = arith.constant 0 : index
    %c0_11 = arith.constant 0 : index
    %c0_12 = arith.constant 0 : index
    %12 = vector.load %arg9[%c0_10, %c0_11, %c0_12] : memref<1x8x8xf32, #tpu.memory_space<vmem>>, vector<1x8x8xf32>
    %13 = vector.shape_cast %12 : vector<1x8x8xf32> to vector<8x8xf32>
    %14 = vector.shape_cast %11 : vector<8x8xf32> to vector<1x8x8xf32>
    tpu.vector_store %arg9[%c0_10, %c0_11, %c0_12], %14 {strides = array<i32>} : memref<1x8x8xf32, #tpu.memory_space<vmem>>, vector<1x8x8xf32>,
    return
  }
  func.func @transform_0(%arg0: i32, %arg1: i32, %arg2: i32) -> (i32, i32, i32) {
    %c0_i32 = arith.constant 0 : i32
    %c0_i32_0 = arith.constant 0 : i32
    return %arg0, %arg1, %c0_i32 : i32, i32, i32
  }
  func.func @transform_1(%arg0: i32, %arg1: i32, %arg2: i32) -> (i32, i32, i32) {
    %c0_i32 = arith.constant 0 : i32
    %c0_i32_0 = arith.constant 0 : i32
    return %arg0, %arg2, %c0_i32 : i32, i32, i32
  }
  func.func @transform_2(%arg0: i32, %arg1: i32, %arg2: i32) -> (i32, i32) {
    %c0_i32 = arith.constant 0 : i32
    %c0_i32_0 = arith.constant 0 : i32
    %c0_i32_1 = arith.constant 0 : i32
    return %c0_i32, %c0_i32_0 : i32, i32
  }
  func.func @transform_3(%arg0: i32, %arg1: i32, %arg2: i32) -> (i32, i32) {
    %c0_i32 = arith.constant 0 : i32
    %c0_i32_0 = arith.constant 0 : i32
    %c0_i32_1 = arith.constant 0 : i32
    return %c0_i32, %c0_i32_0 : i32, i32
  }
  func.func @transform_4(%arg0: i32, %arg1: i32, %arg2: i32) -> (i32, i32) {
    %c0_i32 = arith.constant 0 : i32
    %c0_i32_0 = arith.constant 0 : i32
    %c0_i32_1 = arith.constant 0 : i32
    return %c0_i32, %c0_i32_0 : i32, i32
  }
  func.func @transform_5(%arg0: i32, %arg1: i32, %arg2: i32) -> (i32, i32) {
    %c0_i32 = arith.constant 0 : i32
    %c0_i32_0 = arith.constant 0 : i32
    %c0_i32_1 = arith.constant 0 : i32
    return %c0_i32, %c0_i32_0 : i32, i32
  }
  func.func @transform_6(%arg0: i32, %arg1: i32, %arg2: i32) -> (i32, i32, i32) {
    %c0_i32 = arith.constant 0 : i32
    return %arg0, %arg1, %arg2 : i32, i32, i32
  }
}

</mosaic_0001>

<bundles_post_ra>
// kernel: tpu_custom_call.1
= control target key start
LH: loop header
LB: loop body
LE: loop exit
PB: predicated region body
PF: predicated region fallthrough
CT: control target
= control target key end

     0   :  { %s1483_s0 = inlined_call_operand.hbm [shape: f32[2,8,32], index: 0, kind: input, shape index: {}]   ;;  %s1484_s1 = inlined_call_operand.hbm [shape: f32[2,8,32], index: 1, kind: input, shape index: {}]   ;;  %s1485_s2 = inlined_call_operand.hbm [shape: f32[32,128], index: 2, kind: input, shape index: {}]   ;;  %s1486_s3 = inlined_call_operand.vmem [shape: f32[1,128], index: 3, kind: input, shape index: {}]   ;;  %s1487_s4 = inlined_call_operand.hbm [shape: f32[32,128], index: 4, kind: input, shape index: {}]   ;;  %s1488_s5 = inlined_call_operand.vmem [shape: f32[1,128], index: 5, kind: input, shape index: {}]   ;;  %s1489_s6 = inlined_call_operand.hbm [shape: f32[2,8,8], index: 6, kind: output, shape index: {}]  }
   0x1   :  { %1496 = sst [smem:[#allocation20_spill]] %s1485_s2 }
   0x2   :  { %1497 = sst [smem:[#allocation21_spill]] %s1487_s4 }
   0x3   :  { %11 = vsyncpa [#allocation4], 0 }
   0x4   :  { %13 = vsyncpa [#allocation4 + $0x1], 0 }
   0x5   :  { %14 = vsyncpa [#allocation7], 0 }
   0x6   :  { %16 = vsyncpa [#allocation7 + $0x1], 0 }
   0x7   :  { %17 = vsyncpa [#allocation10], 0 }
   0x8   :  { %18 = vsyncpa [#allocation5], 0 }
   0x9   :  { %20 = vsyncpa [#allocation5 + $0x1], 0  ;;  %s1181_s21 = smov 0   ;;  %s1183_s22 = smov 0  }
   0xa   :  { %s1185_s23 = smov 0   ;;  %s1187_s24 = smov 0  }
   0xb   :  { %s1189_s25 = smov 0   ;;  %s1191_s26 = smov 0  }
   0xc LB: > { %1498 = sst [smem:[#allocation17_spill]] %s1130_s25  ;;  %s1212_s27 = sadd.s32 4294967295, %s1134_s26   ;;  %s1134_s26 = sphi %s1191_s26, %s26_s26   ;;  %s1130_s25 = sphi %s1189_s25, %s1521_s25   ;;  %s1126_s24 = sphi %s1187_s24, %s1520_s24   ;;  %s1122_s23 = sphi %s1185_s23, %s1524_s23   ;;  %s1118_s22 = sphi %s1183_s22, %s1523_s22   ;;  %s1114_s21 = sphi %s1181_s21, %s1522_s21  }
   0xd   : > { %s757_s28 = sadd.s32 4294967294, %s1134_s26   ;;  %p67_p0 = scmp.ne.s32.totalorder %s1118_s22, %s1114_s21 }
   0xe   : > { %p1490_p1 = scmp.eq.s32.totalorder %s1212_s27, 0  ;;  %p213_p3 = scmp.eq.s32.totalorder %s757_s28, 1 }
   0xf   : > { %p758_p5 = scmp.ge.s32.totalorder %s1134_s26, 1  ;;  %p220_p7 = scmp.lt.s32.totalorder %s1134_s26, 3 }
  0x10   : > { %p1221_p4 = por %p1490_p1, %p67_p0  ;;  %p1226_p6 = por %p213_p3, %p67_p0 }
  0x11   : > { %p1231_p8 = pnand %p758_p5, %p220_p7  ;;  %s1136_s8 = smov [#allocation8]  }
  0x12   : > { %s1499_s29 = scalar_select %p1221_p4, 1, 0 }
  0x13   : > { %s1500_s30 = scalar_select %p1226_p6, 1, 0 }
  0x14   : > { %s1501_s7 = scalar_select %p1231_p8, 1, 0 }
  0x15   : > { %s232_s9 = sshll.u32 %s1136_s8, 4  ;;  %p845_p9 = pneg %p1231_p8  ;;  %s1235_s9 = int_to_ptr.vmem [resolvable:$true] %s232_s9 }
  0x16   : > { %s1137_s11 = smov [#allocation9]   ;;  %s1503_s2 = sld [smem:[#allocation20_spill]] }
  0x17   : > { %p1242_p11 = pnand %p845_p9, %p1490_p1  ;;  %s248_s12 = sshll.u32 %s1137_s11, 4  ;;  %s1246_s12 = int_to_ptr.vmem [resolvable:$true] %s248_s12 }
  0x19   : > { %p926_p13 = pneg %p1242_p11 }
  0x1c   : > { %s924_s15 = scalar_lea.hbm %s1503_s2, 512 }
  0x1d   : > { %p925_p12 = scmp.ne.s32.totalorder %s1503_s2, %s924_s15  ;;  %p931_p5 = scmp.lt.u32.totalorder %s924_s15, %s1503_s2 }
  0x1f   : > { %p927_p0 = pnand %p926_p13, %p925_p12 }
  0x21   : > { %p928_p3 = pneg %p927_p0 }
  0x23   : > { %p933_p7 = pnand %p931_p5, %p928_p3 }
  0x25   : > { %936 = shalt.err (!%p933_p7)
}
  0x26   : > { %s937_s20 = scalar_lea.vmem %s1235_s9, 512  ;;  %p945_p2 = scmp.lt.s32.totalorder %s1235_s9, %s1235_s9 }
  0x27   : > { %p938_p9 = scmp.ne.s32.totalorder %s1235_s9, %s937_s20  ;;  %p946_p12 = scmp.lt.s32.totalorder %s937_s20, %s937_s20 }
  0x29   : > { %p940_p10 = pnand %p938_p9, %p926_p13  ;;  %p947_p0 = por %p946_p12, %p945_p2 }
  0x2b   : > { %p941_p1 = pneg %p940_p10 }
  0x2d   : > { %p948_p6 = pnand %p947_p0, %p941_p1 }
  0x2f   : > { %951 = shalt.err (!%p948_p6)
}
  0x30   : > { %s1138_s28 = smov 128   ;;  %s1139_s8 = smov 8  }
  0x31   : > { %848 = dma.hbm_to_vmem [thread:$0]  (!%p1242_p11), %s1503_s2, 512, %s1235_s9, [#allocation7], %s1138_s28, %s1138_s28, %s1139_s8  }
  0x32   : > { %s1504_s4 = sld [smem:[#allocation21_spill]] }
  0x38   : > { %s952_s16 = scalar_lea.hbm %s1504_s4, 512 }
  0x39   : > { %p953_p2 = scmp.ne.s32.totalorder %s1504_s4, %s952_s16  ;;  %p959_p10 = scmp.lt.u32.totalorder %s952_s16, %s1504_s4 }
  0x3b   : > { %p955_p1 = pnand %p953_p2, %p926_p13 }
  0x3d   : > { %p956_p6 = pneg %p955_p1 }
  0x3f   : > { %p961_p3 = pnand %p959_p10, %p956_p6 }
  0x41   : > { %964 = shalt.err (!%p961_p3)
}
  0x42   : > { %s965_s9 = scalar_lea.vmem %s1246_s12, 512  ;;  %p973_p12 = scmp.lt.s32.totalorder %s1246_s12, %s1246_s12 }
  0x43   : > { %p966_p5 = scmp.ne.s32.totalorder %s1246_s12, %s965_s9  ;;  %p974_p0 = scmp.lt.s32.totalorder %s965_s9, %s965_s9 }
  0x45   : > { %p968_p7 = pnand %p966_p5, %p926_p13  ;;  %p975_p2 = por %p974_p0, %p973_p12 }
  0x47   : > { %p969_p9 = pneg %p968_p7 }
  0x49   : > { %p976_p1 = pnand %p975_p2, %p969_p9 }
  0x4b   : > { %979 = shalt.err (!%p976_p1)
}
  0x4c   : > { %851 = dma.hbm_to_vmem [thread:$0]  (!%p1242_p11), %s1504_s4, 512, %s1246_s12, [#allocation10], %s1138_s28, %s1138_s28, %s1139_s8  }
  0x4d   : > { %s45_s14 = sadd.s32 1, %s1130_s25  ;;  %s54_s15 = sadd.s32 1, %s1122_s23 }
  0x4e   : > { %p47_p13 = scmp.ge.s32.totalorder %s45_s14, 2  ;;  %p61_p6 = scmp.ne.s32.totalorder %s1122_s23, %s1118_s22 }
  0x4f   : > { %p62_p10 = scmp.eq.s32.totalorder %s1134_s26, 0  ;;  %p865_p3 = scmp.lt.s32.totalorder %s1134_s26, 2 }
  0x50   : > { %s1526_s14 = smov (%p47_p13, %s45_s14), 0  ;;  %p1506_p7 = scmp.eq.s32.totalorder %s1212_s27, 1 }
  0x51   : > { %1505 = sst [smem:[#allocation18_spill]] %s1526_s14  ;;  %p63_p5 = por %p62_p10, %p61_p6 }
  0x52   : > { %p1310_p9 = por %p1506_p7, %p61_p6  ;;  %s49_s16 = ssub.s32 %s1130_s25, %s1526_s14 }
  0x53   : > { %s265_s17 = sand.u32 1, %s1122_s23   ;;  %p52_p12 = scmp.eq.s32.totalorder %s49_s16, 0 }
  0x54   : > { %s1507_s10 = scalar_select %p1310_p9, 1, 0 }
  0x55   : > { %s1317_s12 = sshll.u32 %s265_s17, 3  ;;  %s763_s28 = sshll.u32 %s1130_s25, 7 }
  0x56   : > { %s1321_s8 = scalar_select %p52_p12, %s1122_s23, %s54_s15  }
  0x57   : > { %s1326_s20 = scalar_lea.hbm %s1483_s0, %s763_s28  ;;  %s269_s9 = scalar_lea.vmem [#allocation3], %s1317_s12 }
  0x58   : > { %1508 = sst [smem:[#allocation19_spill]] %s1321_s8  ;;  %s277_s11 = sshll.u32 %s269_s9, 4  ;;  %s1335_s11 = int_to_ptr.vmem [resolvable:$true] %s277_s11 }
  0x59   : > { %p1331_p11 = pnand %p865_p3, %p63_p5  ;;  %s1340_s18 = scalar_lea.hbm %s1484_s1, %s763_s28 }
  0x5a   : > { %s266_s19 = scalar_lea.sflag [#allocation4], %s265_s17  ;;  %s980_s2 = scalar_lea.hbm %s1326_s20, 128 }
  0x5b   : > { %p981_p0 = scmp.ne.s32.totalorder %s1326_s20, %s980_s2  ;;  %p982_p2 = pneg %p1331_p11 }
  0x5c   : > { %s985_s14 = scalar_lea.hbm %s1483_s0, 256  ;;  %p986_p6 = scmp.lt.u32.totalorder %s1326_s20, %s1483_s0 }
  0x5d   : > { %p983_p1 = pnand %p982_p2, %p981_p0  ;;  %p987_p10 = scmp.lt.u32.totalorder %s985_s14, %s980_s2 }
  0x5e   : > { %p989_p5 = scmp.lt.u32.totalorder %s980_s2, %s1326_s20 }
  0x5f   : > { %p984_p13 = pneg %p983_p1  ;;  %p988_p3 = por %p987_p10, %p986_p6 }
  0x61   : > { %p990_p7 = por %p989_p5, %p988_p3 }
  0x63   : > { %p991_p12 = pnand %p990_p7, %p984_p13 }
  0x65   : > { %994 = shalt.err (!%p991_p12)
}
  0x66   : > { %s995_s17 = scalar_lea.vmem %s1335_s11, 128  ;;  %s1140_s4 = smov [#allocation3]  }
  0x67   : > { %p996_p0 = scmp.ne.s32.totalorder %s1335_s11, %s995_s17  ;;  %s1000_s28 = sshll.u32 %s1140_s4, 4  ;;  %s1001_s28 = int_to_ptr.vmem [resolvable:$false] %s1000_s28 }
  0x68   : > { %s1002_s25 = scalar_lea.vmem %s1001_s28, 256  ;;  %p1003_p4 = scmp.lt.s32.totalorder %s1335_s11, %s1001_s28 }
  0x69   : > { %p998_p1 = pnand %p996_p0, %p982_p2  ;;  %p1004_p6 = scmp.lt.s32.totalorder %s1002_s25, %s995_s17 }
  0x6b   : > { %p999_p9 = pneg %p998_p1  ;;  %p1005_p10 = por %p1004_p6, %p1003_p4 }
  0x6d   : > { %p1006_p3 = pnand %p1005_p10, %p999_p9 }
  0x6f   : > { %1009 = shalt.err (!%p1006_p3)
}
  0x70   : > { %855 = dma.hbm_to_vmem [thread:$0]  (!%p1331_p11), %s1326_s20, 128, %s1335_s11, %s266_s19  }
  0x71   : > { %s284_s2 = sand.u32 1, %s1134_s26   ;;  %s288_s14 = scalar_lea.vmem [#allocation6], %s1317_s12 }
  0x72   : > { %s296_s8 = sshll.u32 %s288_s14, 4  ;;  %s285_s15 = scalar_lea.sflag [#allocation7], %s284_s2  ;;  %s297_s8 = int_to_ptr.vmem [resolvable:$true] %s296_s8 }
  0x73   : > { %s1010_s16 = scalar_lea.hbm %s1340_s18, 128  ;;  %s1015_s4 = scalar_lea.hbm %s1484_s1, 256 }
  0x74   : > { %p1011_p4 = scmp.ne.s32.totalorder %s1340_s18, %s1010_s16  ;;  %p1016_p5 = scmp.lt.u32.totalorder %s1340_s18, %s1484_s1 }
  0x75   : > { %p1017_p7 = scmp.lt.u32.totalorder %s1015_s4, %s1010_s16  ;;  %p1019_p0 = scmp.lt.u32.totalorder %s1010_s16, %s1340_s18 }
  0x76   : > { %p1013_p9 = pnand %p1011_p4, %p982_p2 }
  0x77   : > { %p1018_p12 = por %p1017_p7, %p1016_p5 }
  0x78   : > { %p1014_p13 = pneg %p1013_p9 }
  0x79   : > { %p1020_p1 = por %p1019_p0, %p1018_p12 }
  0x7b   : > { %p1021_p6 = pnand %p1020_p1, %p1014_p13 }
  0x7d   : > { %1024 = shalt.err (!%p1021_p6)
}
  0x7e   : > { %s1025_s12 = scalar_lea.vmem %s297_s8, 128  ;;  %s1141_s20 = smov [#allocation6]  }
  0x7f   : > { %p1026_p10 = scmp.ne.s32.totalorder %s297_s8, %s1025_s12  ;;  %s1030_s11 = sshll.u32 %s1141_s20, 4  ;;  %s1031_s11 = int_to_ptr.vmem [resolvable:$false] %s1030_s11 }
  0x80   : > { %s1032_s19 = scalar_lea.vmem %s1031_s11, 256  ;;  %p1033_p9 = scmp.lt.s32.totalorder %s297_s8, %s1031_s11 }
  0x81   : > { %p1028_p3 = pnand %p1026_p10, %p982_p2  ;;  %p1034_p8 = scmp.lt.s32.totalorder %s1032_s19, %s1025_s12 }
  0x83   : > { %p1029_p4 = pneg %p1028_p3  ;;  %p1035_p5 = por %p1034_p8, %p1033_p9 }
  0x85   : > { %p1036_p7 = pnand %p1035_p5, %p1029_p4 }
  0x87   : > { %1039 = shalt.err (!%p1036_p7)
}
  0x88   : > { %858 = dma.hbm_to_vmem [thread:$0]  (!%p1331_p11), %s1340_s18, 128, %s297_s8, %s285_s15  }
  0x89   : > { %p1510_p13 = scmp.ne.s32.totalorder %s1501_s7, 0 }
  0x8a   : > { %s1391_s2 = sand.u32 (!%p1510_p13), 1, %s1118_s22   ;;  %p1511_p8 = scmp.ne.s32.totalorder (!%p1510_p13), %s1499_s29, 0 }
  0x8b   : > { %305 = sbr.rel (%p1510_p13) target bundleno = 611 (0x263), region = 44  ;;  %s1394_s14 = sshll.u32 (!%p1510_p13), %s1391_s2, 3 }
  0x8c   : > { %s308_s16 = scalar_lea.sflag (!%p1510_p13), [#allocation4], %s1391_s2  ;;  %s311_s9 = scalar_lea.vmem (!%p1510_p13), [#allocation3], %s1394_s14 }
  0x92   : > { %1093 = dma.done.wait (%p1511_p8), %s308_s16, 128  }
  0x93   : > { %1095 = vsyncadd (%p1511_p8), %s308_s16, 4294967168  ;;  %s316_s7 = sand.u32 1, %s1212_s27   ;;  %s320_s18 = scalar_lea.vmem [#allocation6], %s1394_s14 }
  0x94   : > { %s317_s13 = scalar_lea.sflag [#allocation7], %s316_s7 }
  0x95   : > { %1097 = dma.done.wait (%p1511_p8), %s317_s13, 128  }
  0x96   : > { %1099 = vsyncadd (%p1511_p8), %s317_s13, 4294967168  ;;  %p1512_p11 = scmp.eq.s32.totalorder %s1212_s27, 0 }
  0x98   : > { %1101 = dma.done.wait (%p1512_p11), [#allocation7], 512   ;;  %p1513_p2 = pmov %p1512_p11 }
  0x9a   : > { %1103 = vsyncadd (%p1513_p2), [#allocation7], 4294966784  ;;  %p1514_p12 = pmov %p1513_p2 }
  0x9b   : > { %p1515_p0 = pmov %p1513_p2 }
  0x9c   : > { %1105 = dma.done.wait (%p1514_p12), [#allocation10], 512  }
  0x9d   : > { %1107 = vsyncadd (%p1515_p0), [#allocation10], 4294966784  ;;  %v1142_v0 = vmov 0.0|0.0   ;;  %vm1143_vm0 = vmmov 0   ;;  %v1144_v1 = vmov 0.0   ;;  %v455_v2 = vld [vmem:[#allocation9] sm:$0xff] }
  0x9e   : > { %825 = vmatprep.subr.bf16.mxu1 %v1142_v0  ;;  %819 = vmatprep.subr.bf16.mxu0 %v1142_v0  ;;  %v456_v3 = vld [vmem:[#allocation9 + $0x8] sm:$0xff]  ;;  %v367_v4 = vld [vmem:[#allocation8] sm:$0xff]  ;;  %v457_v7 = vld [vmem:[#allocation9 + $0x10] sm:$0xff]  ;;  %vm378_vm1 = vcmask 261120   ;;  %s777_s17 = sshll.u32 %s1126_s24, 7  ;;  %s361_s4 = scalar_lea.vmem [#allocation11], %s1394_s14 }
  0x9f   : > { %811 = vmatprep.mubr.msk.f32.mxu1 %vm1143_vm0, %v1144_v1  ;;  %800 = vmatprep.mubr.msk.f32.mxu0 %vm1143_vm0, %v1144_v1  ;;  %v826_v5 = vpack.c.bf16 %v456_v3, %v455_v2  ;;  %v368_v6 = vld [vmem:[#allocation8 + $0x8] sm:$0xff]  ;;  %v458_v8 = vld [vmem:[#allocation9 + $0x18] sm:$0xff]  ;;  %v369_v10 = vld [vmem:[#allocation8 + $0x10] sm:$0xff]  ;;  %s629_s28 = sshll.u32 %s361_s4, 4  ;;  %vm611_vm2 = vcmask 64512   ;;  %s1434_s20 = scalar_lea.hbm %s1489_s6, %s777_s17  ;;  %s1436_s28 = int_to_ptr.vmem [resolvable:$true] %s629_s28 }
  0xa0   : > { %v820_v9 = vpack.c.bf16 %v368_v6, %v367_v4  ;;  %v370_v11 = vld [vmem:[#allocation8 + $0x18] sm:$0xff]  ;;  %v829_v12 = vpack.c.bf16 %v458_v8, %v457_v7  ;;  %v366_v15 = vld [vmem:[%s311_s9] sm:$0xff]  ;;  %s614_s11 = scalar_lea.sflag [#allocation5], %s1391_s2  ;;  %s1040_s19 = scalar_lea.vmem %s1436_s28, 128 }
  0xa1   : > { %827 = vmatpush3.bf16.msra.mxu1 %v826_v5  ;;  %v823_v13 = vpack.c.bf16 %v370_v11, %v369_v10  ;;  %v454_v14 = vld [vmem:[%s320_s18] sm:$0xff]  ;;  %v774_v16 = vld [vmem:[%s1488_s5] ss:$0 sm:$0xff]  ;;  %p1041_p1 = scmp.ne.s32.totalorder %s1436_s28, %s1040_s19  ;;  %p1516_p6 = scmp.ne.s32.totalorder %s1507_s10, 0 }
  0xa2   : > { %821 = vmatpush3.bf16.msra.mxu0 %v820_v9  ;;  %828 = vmatprep.subr.bf16.mxu1 %v1142_v0  ;;  %v772_v17 = vld [vmem:[%s1486_s3] ss:$0 sm:$0xff]  ;;  %s1145_s24 = smov [#allocation11]  }
  0xa3   : > { %822 = vmatprep.subr.bf16.mxu0 %v1142_v0  ;;  %p1042_p10 = pnand %p1041_p1, %p1516_p6  ;;  %s1044_s14 = sshll.u32 %s1145_s24, 4  ;;  %s1045_s14 = int_to_ptr.vmem [resolvable:$false] %s1044_s14 }
  0xa4   : > { %s1046_s16 = scalar_lea.vmem %s1045_s14, 256  ;;  %p1047_p4 = scmp.lt.s32.totalorder %s1436_s28, %s1045_s14 }
  0xa5   : > { %830 = vmatpush3.bf16.msra.mxu1 %v829_v12  ;;  %p1043_p3 = pneg %p1042_p10  ;;  %p1048_p9 = scmp.lt.s32.totalorder %s1046_s16, %s1040_s19 }
  0xa6   : > { %824 = vmatpush3.bf16.msra.mxu0 %v823_v13 }
  0xa7   : > { %814 = vmatprep.subr.mxu0 %v1144_v1  ;;  %p1049_p5 = por %p1048_p9, %p1047_p4 }
  0xa8   : > { %812 = vmatmul.mubr.msk.f32.vlgmr.msra.gmra.mrb[0].mxu1 %vm378_vm1, %v454_v14 }
  0xa9   : > { %801 = vmatmul.mubr.msk.f32.vlgmr.msra.gmra.mrb[0].mxu0 %vm378_vm1, %v366_v15  ;;  %p1050_p7 = pnand %p1049_p5, %p1043_p3 }
  0xaa   : > { %816 = vmatprep.mubr.msk.f32.mxu0 %vm1143_vm0, %v1144_v1 }
 0x17b   : > { %v536_v18 = vpop.f32.mrb[0].mxu1 }
 0x17c   : > { %v537_v19 = vadd.f32 %v774_v16, %v536_v18  ;;  %v448_v20 = vpop.f32.mrb[0].mxu0  ;;  %v813_v21 = vpop.f32.mrb[1].mxu1 }
 0x17d   : > { %v449_v22 = vadd.f32 %v772_v17, %v448_v20  ;;  %v802_v23 = vpop.f32.mrb[1].mxu0 }
 0x17e   : > { %815 = vmatpush3.xpose.msra.mxu0 %v537_v19 }
 0x17f   : > { %v452_v24 = vmul.f32 0.17677669, %v449_v22 }
 0x181   : > { %817 = vmatmul.mubr.f32.vlgmr.msra.gmra.mrb[2].mxu0 %v452_v24 }
 0x254   : > { %v607_v25 = vpop.f32.mrb[2].mxu0 }
 0x255   : > { %612 = vst.msk [vmem:[%s361_s4] sm:$0xff] %vm611_vm2, %v607_v25  ;;  %v818_v26 = vpop.f32.mrb[3].mxu0 }
 0x256   : > { %1053 = shalt.err (!%p1050_p7)
}
 0x257   : > { %s1054_s2 = scalar_lea.hbm %s1434_s20, 128  ;;  %s1058_s13 = scalar_lea.hbm %s1489_s6, 256 }
 0x258   : > { %p1055_p13 = scmp.ne.s32.totalorder %s1434_s20, %s1054_s2  ;;  %p1059_p2 = scmp.lt.u32.totalorder %s1434_s20, %s1489_s6 }
 0x259   : > { %p1060_p12 = scmp.lt.u32.totalorder %s1058_s13, %s1054_s2  ;;  %p1062_p1 = scmp.lt.u32.totalorder %s1054_s2, %s1434_s20 }
 0x25a   : > { %p1056_p8 = pnand %p1055_p13, %p1516_p6 }
 0x25b   : > { %p1061_p0 = por %p1060_p12, %p1059_p2 }
 0x25c   : > { %p1057_p11 = pneg %p1056_p8 }
 0x25d   : > { %p1063_p10 = por %p1062_p1, %p1061_p0 }
 0x25f   : > { %p1064_p3 = pnand %p1063_p10, %p1057_p11 }
 0x261   : > { %1067 = shalt.err (!%p1064_p3)
}
 0x262   : > { %843 = dma.vmem_to_hbm [thread:$0]  (%p1516_p6), %s1436_s28, 128, %s1434_s20, %s614_s11  }
 0x263 PF: > { %s641_s29 = sand.u32 1, %s1114_s21   ;;  %p1517_p4 = scmp.ne.s32.totalorder %s1500_s30, 0 }
 0x264   : > { %p1518_p9 = scmp.ge.s32.totalorder %s1134_s26, 2  ;;  %s642_s8 = scalar_lea.sflag [#allocation5], %s641_s29 }
 0x266   : > { %p860_p5 = pnand %p1518_p9, %p1517_p4 }
 0x268   : > { %1109 = dma.done.wait (!%p860_p5), %s642_s8, 128  }
 0x269   : > { %1111 = vsyncadd (!%p860_p5), %s642_s8, 4294967168  ;;  %s26_s26 = sadd.s32 1, %s1134_s26   ;;  %s1519_s10 = sld [smem:[#allocation19_spill]] }
 0x26a   : > { %p23_p7 = scmp.ge.s32.totalorder %s26_s26, 4   ;;  %s1520_s24 = sld [smem:[#allocation17_spill]] }
 0x26b   : > { %s1521_s25 = sld [smem:[#allocation18_spill]]  ;;  %s1522_s21 = smov %s1118_s22 }
 0x26c   : > { %s1523_s22 = smov %s1122_s23  ;;  %25 = sbr.rel (!%p23_p7) target bundleno = 12 (0xc), region = 114 }
 0x26f   : > { %s1524_s23 = smov %s1519_s10 }
 0x273   :  { %647 = vsyncpa [#allocation4], 1 }
 0x274   :  { %649 = vsyncpa [#allocation4 + $0x1], 1 }
 0x275   :  { %650 = vsyncpa [#allocation7], 1 }
 0x276   :  { %652 = vsyncpa [#allocation7 + $0x1], 1 }
 0x277   :  { %653 = vsyncpa [#allocation10], 1 }
 0x278   :  { %654 = vsyncpa [#allocation5], 1 }
 0x279   :  { %656 = vsyncpa [#allocation5 + $0x1], 1 }

</bundles_post_ra>
